<compile_context>
chip_gen: v7x
topology: tpu7x:2x2x1
jax: 0.10.0
libtpu: 0.0.40
codegen_flags: <defaults>
</compile_context>

<pallas_src>
import functools
import math

import numpy as np

import jax
import jax.numpy as jnp
from jax.experimental import pallas as pl
from jax.experimental.pallas import tpu as pltpu


_LANE = 128


# ----------------------------------------------------------------------------
# Host-side (static, shape-dependent) helper matrices
# ----------------------------------------------------------------------------
def _adaptive_pool_matrix(out_size, in_size):
    """PyTorch AdaptiveAvgPool bin-averaging matrix of shape (out_size, in_size)."""
    mat = np.zeros((out_size, in_size), np.float32)
    for i in range(out_size):
        start = (i * in_size) // out_size
        end = -((-(i + 1) * in_size) // out_size)  # ceil((i+1)*in/out)
        mat[i, start:end] = 1.0 / float(end - start)
    return mat


def _shifted_band_matrix(w, c, offset):
    """(C, C) matrix B with B[oc, ic] = w[ic - oc + pad + offset] when valid."""
    k = int(w.shape[0])
    pad = (k - 1) // 2
    oc = np.arange(c)[:, None]
    ic = np.arange(c)[None, :]
    j = ic - oc + pad + offset
    valid = jnp.asarray((j >= 0) & (j < k))
    return jnp.where(valid, w[np.clip(j, 0, k - 1)], 0.0).astype(jnp.float32)


def _vmem_limit_bytes():
    """Generation-aware scoped-VMEM limit (64 MiB on v7x, 128 MiB v5e/v6e)."""
    try:
        cap = int(pltpu.get_tpu_info().vmem_capacity_bytes)
    except Exception:
        cap = 64 * 1024 * 1024  # conservative fallback (v7x per-core VMEM)
    return max(32 * 1024 * 1024, min(int(cap * 0.8), 100 * 1024 * 1024))


def _pick_batch_tile(b, c, s_pad, p2, in_item, out_item, vmem_limit, max_tile=8):
    """Biggest batch tile whose working set fits ~half the VMEM limit,
    preferring an even number of grid steps (v7x has two TensorCores)."""
    if c % 8:  # keep the x block equal to the full array -> no (8,128) issue
        return b
    resident = (2 * (s_pad * p2 * 2) * 2      # pT + uT (bf16), double buffered
                + 2 * (p2 * p2 * 4) * 2       # shift matrices
                + 2 * (4 * c * c * 4))        # wa/wb/wc/wg (f32), double buffered
    budget = int(vmem_limit * 0.5)
    per_b = c * s_pad * (2 * in_item + 2 * out_item + 12) + 10 * c * p2 * 4
    avail = max(budget - resident, per_b)     # always allow bt = 1
    cap = max(1, avail // per_b)
    cands = [d for d in range(1, b + 1) if b % d == 0 and d <= min(max_tile, cap)]
    if not cands:
        return 1
    even = [d for d in cands if (b // d) % 2 == 0]
    return max(even) if even else max(cands)


# ----------------------------------------------------------------------------
# Pallas kernel
# ----------------------------------------------------------------------------
def _sigmoid(z):
    # exp + divide only (guaranteed Mosaic lowering); |z| is small here.
    return 1.0 / (1.0 + jnp.exp(-z))


def _mlca_kernel(x_ref, pT_ref, uT_ref, sp_ref, sn_ref, wa_ref, wb_ref, wc_ref,
                 wg_ref, o_ref, mix_ref, *, local_weight, batch_tile, channels):
    c = channels
    lw = local_weight

    xb = x_ref[...]                                    # (bt*C, S_pad), input dtype
    x_bf = xb.astype(jnp.bfloat16)

    # adaptive downsample (H,W)->(ls,ls): one bf16 MXU matmul with M = bt*C
    local_cp = jnp.dot(x_bf, pT_ref[...],
                       preferred_element_type=jnp.float32)          # (bt*C, P2) f32

    # pooled bins shifted to the previous / next spatial bin (zero padded)
    prev_cp = jnp.dot(local_cp, sp_ref[...],
                      preferred_element_type=jnp.float32)            # (bt*C, P2)
    next_cp = jnp.dot(local_cp, sn_ref[...],
                      preferred_element_type=jnp.float32)            # (bt*C, P2)

    wa = wa_ref[...]          # local conv taps reaching the previous spatial bin
    wb = wb_ref[...]          # local conv taps inside the same spatial bin
    wc = wc_ref[...]          # local conv taps reaching the next spatial bin
    wg = wg_ref[...]          # global channel-conv band

    # Per-batch-element work is only the tiny (C,C)x(C,25) channel mixes; the
    # S-sized matmuls / loads / stores above and below are fully batch-fused.
    for i in range(batch_tile):
        a_i = local_cp[i * c:(i + 1) * c, :]                         # (C, P2)
        p_i = prev_cp[i * c:(i + 1) * c, :]
        n_i = next_cp[i * c:(i + 1) * c, :]

        # global branch: mean over the ls*ls bins first, then the channel conv
        # (exact reorder of the reference: both operations are linear)
        g_i = jnp.mean(a_i, axis=1, keepdims=True)                   # (C, 1)
        y_g = jnp.dot(wg, g_i, preferred_element_type=jnp.float32)   # (C, 1)
        att_g = _sigmoid(y_g)

        # local branch: banded conv over the flattened (bin-major, channel-minor)
        # sequence, decomposed into same / previous / next bin contributions
        y_l = (jnp.dot(wb, a_i, preferred_element_type=jnp.float32)
               + jnp.dot(wa, p_i, preferred_element_type=jnp.float32)
               + jnp.dot(wc, n_i, preferred_element_type=jnp.float32))
        att_l = _sigmoid(y_l)                                        # (C, P2)

        mix_ref[pl.ds(i * c, c), :] = lw * att_l + (1.0 - lw) * att_g

    # adaptive upsample (ls,ls)->(H,W) fused with the attention application:
    # one bf16 MXU matmul with M = bt*C and a single lane-dense store.
    att_all = jnp.dot(mix_ref[...].astype(jnp.bfloat16), uT_ref[...],
                      preferred_element_type=jnp.float32)            # (bt*C, S_pad)
    o_ref[...] = (xb.astype(jnp.float32) * att_all).astype(o_ref.dtype)


# ----------------------------------------------------------------------------
# Wrapper
# ----------------------------------------------------------------------------
def mlca_forward(x, w_local, w_global, *, local_size=5, local_weight=0.5,
                 max_batch_tile=8):
    b, c, m, n = x.shape
    k = int(w_local.shape[0])
    assert int(w_global.shape[0]) == k
    pad = (k - 1) // 2
    assert pad < c, "conv half-width must be smaller than the channel count"

    s = m * n
    s_pad = -(-s // _LANE) * _LANE        # lane-dense spatial extent
    p2 = local_size * local_size

    # static pooling / upsampling matrices (zero padded along S)
    ph = _adaptive_pool_matrix(local_size, m)                 # (ls, m)
    pw = _adaptive_pool_matrix(local_size, n)                 # (ls, n)
    pcomb = np.einsum("ri,cj->rcij", ph, pw).reshape(p2, s)   # (P2, S)
    uh = _adaptive_pool_matrix(m, local_size)                 # (m, ls)
    uw = _adaptive_pool_matrix(n, local_size)                 # (n, ls)
    ucomb = np.einsum("ir,jc->ijrc", uh, uw).reshape(s, p2)   # (S, P2)
    pcomb_p = np.zeros((p2, s_pad), np.float32)
    pcomb_p[:, :s] = pcomb
    ucomb_p = np.zeros((s_pad, p2), np.float32)
    ucomb_p[:s, :] = ucomb
    pT = jnp.asarray(pcomb_p.T, dtype=jnp.bfloat16)           # (S_pad, P2)
    uT = jnp.asarray(ucomb_p.T, dtype=jnp.bfloat16)           # (P2, S_pad)

    # spatial-bin shift matrices (previous / next bin, zero fill at the ends)
    sprev = jnp.asarray(np.eye(p2, k=1, dtype=np.float32))    # A @ sprev -> bin p-1
    snext = jnp.asarray(np.eye(p2, k=-1, dtype=np.float32))   # A @ snext -> bin p+1

    # banded conv matrices (built from the runtime conv weights, kept f32)
    w_l = w_local.astype(jnp.float32)
    w_g = w_global.astype(jnp.float32)
    wb_mat = _shifted_band_matrix(w_l, c, 0)       # taps inside the same bin
    wa_mat = _shifted_band_matrix(w_l, c, -c)      # taps reaching the previous bin
    wc_mat = _shifted_band_matrix(w_l, c, c)       # taps reaching the next bin
    wg_mat = _shifted_band_matrix(w_g, c, 0)       # global channel conv

    x_flat = x.reshape(b, c, s)
    if s_pad != s:
        x_flat = jnp.pad(x_flat, ((0, 0), (0, 0), (0, s_pad - s)))
    x2d = x_flat.reshape(b * c, s_pad)

    itemsize = jnp.dtype(x.dtype).itemsize
    vmem_limit = _vmem_limit_bytes()
    bt = _pick_batch_tile(b, c, s_pad, p2, itemsize, itemsize, vmem_limit,
                          max_tile=max_batch_tile)
    grid = (b // bt,)
    rows = bt * c

    kernel = functools.partial(_mlca_kernel, local_weight=float(local_weight),
                               batch_tile=bt, channels=c)

    out2d = pl.pallas_call(
        kernel,
        out_shape=jax.ShapeDtypeStruct((b * c, s_pad), x.dtype),
        grid_spec=pltpu.PrefetchScalarGridSpec(
            num_scalar_prefetch=0,
            grid=grid,
            in_specs=[
                pl.BlockSpec((rows, s_pad), lambda i: (i, 0)),   # x block
                pl.BlockSpec((s_pad, p2), lambda i: (0, 0)),     # downsample (resident)
                pl.BlockSpec((p2, s_pad), lambda i: (0, 0)),     # upsample (resident)
                pl.BlockSpec((p2, p2), lambda i: (0, 0)),        # shift to prev bin
                pl.BlockSpec((p2, p2), lambda i: (0, 0)),        # shift to next bin
                pl.BlockSpec((c, c), lambda i: (0, 0)),          # WA
                pl.BlockSpec((c, c), lambda i: (0, 0)),          # WB
                pl.BlockSpec((c, c), lambda i: (0, 0)),          # WC
                pl.BlockSpec((c, c), lambda i: (0, 0)),          # Wg
            ],
            out_specs=pl.BlockSpec((rows, s_pad), lambda i: (i, 0)),
            scratch_shapes=[pltpu.VMEM((rows, p2), jnp.float32)],
        ),
        compiler_params=pltpu.CompilerParams(
            dimension_semantics=("parallel",),
            vmem_limit_bytes=vmem_limit),
    )(x2d, pT, uT, sprev, snext, wa_mat, wb_mat, wc_mat, wg_mat)

    return out2d.reshape(b, c, s_pad)[:, :, :s].reshape(b, c, m, n)


# ----------------------------------------------------------------------------
# Pure-JAX reference (direct transcription of the PyTorch module)
# ----------------------------------------------------------------------------
def _adaptive_avg_pool2d_ref(x, out_hw):
    _, _, h, w = x.shape
    oh, ow = out_hw
    rows = []
    for i in range(oh):
        hs = (i * h) // oh
        he = -((-(i + 1) * h) // oh)
        cols = []
        for j in range(ow):
            ws = (j * w) // ow
            we = -((-(j + 1) * w) // ow)
            cols.append(jnp.mean(x[:, :, hs:he, ws:we], axis=(2, 3)))
        rows.append(jnp.stack(cols, axis=-1))
    return jnp.stack(rows, axis=-2)


def _conv1d_ref(seq, w):
    k = int(w.shape[0])
    pad = (k - 1) // 2
    length = seq.shape[1]
    padded = jnp.pad(seq, ((0, 0), (pad, pad)))
    out = jnp.zeros_like(seq)
    for j in range(k):
        out = out + w[j] * padded[:, j:j + length]
    return out


def _mlca_reference(x, w_local, w_global, *, local_size=5, local_weight=0.5):
    b, c, m, n = x.shape
    ls = local_size
    local_arv = _adaptive_avg_pool2d_ref(x, (ls, ls))                       # (b,c,ls,ls)
    global_arv = jnp.mean(local_arv, axis=(2, 3))                           # (b,c)
    temp_local = local_arv.reshape(b, c, ls * ls).transpose(0, 2, 1).reshape(b, ls * ls * c)
    y_local = _conv1d_ref(temp_local, w_local)
    y_global = _conv1d_ref(global_arv, w_global)
    att_local = jax.nn.sigmoid(
        y_local.reshape(b, ls * ls, c).transpose(0, 2, 1).reshape(b, c, ls, ls))
    att_global = jax.nn.sigmoid(y_global)[:, :, None, None]                 # 1x1 replicate
    att_small = att_global * (1.0 - local_weight) + att_local * local_weight
    att_all = _adaptive_avg_pool2d_ref(att_small, (m, n))
    return x * att_all


# ----------------------------------------------------------------------------
# Demo
# ----------------------------------------------------------------------------
if __name__ == "__main__":
    b, c, m, n = 2, 32, 16, 16
    local_size, local_weight = 5, 0.5
    gamma, bias = 2, 1

    # kernel size exactly as in the PyTorch module
    t = int(abs(math.log(c, 2) + bias) / gamma)
    k = t if t % 2 else t + 1

    key = jax.random.PRNGKey(0)
    kx, kl, kg = jax.random.split(key, 3)
    x = jax.random.normal(kx, (b, c, m, n), dtype=jnp.float32)
    bound = 1.0 / math.sqrt(k)
    w_local = jax.random.uniform(kl, (k,), jnp.float32, -bound, bound)
    w_global = jax.random.uniform(kg, (k,), jnp.float32, -bound, bound)

    out = mlca_forward(x, w_local, w_global,
                       local_size=local_size, local_weight=local_weight)
    out = jax.block_until_ready(out)

    ref = _mlca_reference(x, w_local, w_global,
                          local_size=local_size, local_weight=local_weight)
    ref = jax.block_until_ready(ref)

    assert out.shape == x.shape
    max_err = float(jnp.max(jnp.abs(out - ref)))
    # bf16 MXU operands in the kernel -> compare at bf16-level tolerance
    assert jnp.allclose(out, ref, atol=2e-2, rtol=2e-2), f"max abs err = {max_err}"

    print("KERNEL_OK")
</pallas_src>

<mosaic_0001>
module attributes {stable_mosaic.version = 11 : i64} {
  func.func @_mlca_kernel(%arg0: i32, %arg1: memref<32x256xf32, #tpu.memory_space<vmem>>, %arg2: memref<256x25xbf16, #tpu.memory_space<vmem>>, %arg3: memref<25x256xbf16, #tpu.memory_space<vmem>>, %arg4: memref<25x25xf32, #tpu.memory_space<vmem>>, %arg5: memref<25x25xf32, #tpu.memory_space<vmem>>, %arg6: memref<32x32xf32, #tpu.memory_space<vmem>>, %arg7: memref<32x32xf32, #tpu.memory_space<vmem>>, %arg8: memref<32x32xf32, #tpu.memory_space<vmem>>, %arg9: memref<32x32xf32, #tpu.memory_space<vmem>>, %arg10: memref<32x256xf32, #tpu.memory_space<vmem>>, %arg11: memref<32x25xf32, #tpu.memory_space<vmem>>) attributes {dimension_semantics = [#tpu.dimension_semantics<parallel>], iteration_bounds = array<i64: 2>, scalar_prefetch = 0 : i64, scratch_operands = 1 : i64, tpu.core_type = #tpu.core_type<tc>, window_params = [{transform_indices = @transform_0, window_bounds = array<i64: 32, 256>}, {pipeline_mode = #tpu.pipeline_mode<synchronous>, transform_indices = @transform_1, window_bounds = array<i64: 256, 25>}, {pipeline_mode = #tpu.pipeline_mode<synchronous>, transform_indices = @transform_2, window_bounds = array<i64: 25, 256>}, {pipeline_mode = #tpu.pipeline_mode<synchronous>, transform_indices = @transform_3, window_bounds = array<i64: 25, 25>}, {pipeline_mode = #tpu.pipeline_mode<synchronous>, transform_indices = @transform_4, window_bounds = array<i64: 25, 25>}, {pipeline_mode = #tpu.pipeline_mode<synchronous>, transform_indices = @transform_5, window_bounds = array<i64: 32, 32>}, {pipeline_mode = #tpu.pipeline_mode<synchronous>, transform_indices = @transform_6, window_bounds = array<i64: 32, 32>}, {pipeline_mode = #tpu.pipeline_mode<synchronous>, transform_indices = @transform_7, window_bounds = array<i64: 32, 32>}, {pipeline_mode = #tpu.pipeline_mode<synchronous>, transform_indices = @transform_8, window_bounds = array<i64: 32, 32>}, {transform_indices = @transform_9, window_bounds = array<i64: 32, 256>}]} {
    %c0 = arith.constant 0 : index
    %c0_0 = arith.constant 0 : index
    %0 = vector.load %arg1[%c0, %c0_0] : memref<32x256xf32, #tpu.memory_space<vmem>>, vector<32x256xf32>
    %1 = arith.truncf %0 : vector<32x256xf32> to vector<32x256xbf16>
    %c0_1 = arith.constant 0 : index
    %c0_2 = arith.constant 0 : index
    %2 = vector.load %arg2[%c0_1, %c0_2] : memref<256x25xbf16, #tpu.memory_space<vmem>>, vector<256x25xbf16>
    %cst = arith.constant dense<0.000000e+00> : vector<32x25xf32>
    %3 = tpu.matmul %1, %2, %cst {dimension_numbers = #tpu.dot_dimension_numbers<[1], [0], [0], [1], [0, 0, 1, 1], [], []>} : vector<32x256xbf16>, vector<256x25xbf16>, vector<32x25xf32> -> vector<32x25xf32>
    %c0_3 = arith.constant 0 : index
    %c0_4 = arith.constant 0 : index
    %4 = vector.load %arg4[%c0_3, %c0_4] : memref<25x25xf32, #tpu.memory_space<vmem>>, vector<25x25xf32>
    %cst_5 = arith.constant dense<0.000000e+00> : vector<32x25xf32>
    %5 = tpu.matmul %3, %4, %cst_5 {dimension_numbers = #tpu.dot_dimension_numbers<[1], [0], [0], [1], [0, 0, 1, 1], [], []>} : vector<32x25xf32>, vector<25x25xf32>, vector<32x25xf32> -> vector<32x25xf32>
    %c0_6 = arith.constant 0 : index
    %c0_7 = arith.constant 0 : index
    %6 = vector.load %arg5[%c0_6, %c0_7] : memref<25x25xf32, #tpu.memory_space<vmem>>, vector<25x25xf32>
    %cst_8 = arith.constant dense<0.000000e+00> : vector<32x25xf32>
    %7 = tpu.matmul %3, %6, %cst_8 {dimension_numbers = #tpu.dot_dimension_numbers<[1], [0], [0], [1], [0, 0, 1, 1], [], []>} : vector<32x25xf32>, vector<25x25xf32>, vector<32x25xf32> -> vector<32x25xf32>
    %c0_9 = arith.constant 0 : index
    %c0_10 = arith.constant 0 : index
    %8 = vector.load %arg6[%c0_9, %c0_10] : memref<32x32xf32, #tpu.memory_space<vmem>>, vector<32x32xf32>
    %c0_11 = arith.constant 0 : index
    %c0_12 = arith.constant 0 : index
    %9 = vector.load %arg7[%c0_11, %c0_12] : memref<32x32xf32, #tpu.memory_space<vmem>>, vector<32x32xf32>
    %c0_13 = arith.constant 0 : index
    %c0_14 = arith.constant 0 : index
    %10 = vector.load %arg8[%c0_13, %c0_14] : memref<32x32xf32, #tpu.memory_space<vmem>>, vector<32x32xf32>
    %c0_15 = arith.constant 0 : index
    %c0_16 = arith.constant 0 : index
    %11 = vector.load %arg9[%c0_15, %c0_16] : memref<32x32xf32, #tpu.memory_space<vmem>>, vector<32x32xf32>
    %cst_17 = arith.constant dense<0.000000e+00> : vector<32xf32>
    %12 = vector.multi_reduction <add>, %3, %cst_17 [1] : vector<32x25xf32> to vector<32xf32>
    %13 = vector.shape_cast %12 : vector<32xf32> to vector<32x1xf32>
    %cst_18 = arith.constant 2.500000e+01 : f32
    %14 = vector.broadcast %cst_18 : f32 to vector<32x1xf32>
    %15 = arith.divf %13, %14 : vector<32x1xf32>
    %cst_19 = arith.constant dense<0.000000e+00> : vector<32x1xf32>
    %16 = tpu.matmul %11, %15, %cst_19 {dimension_numbers = #tpu.dot_dimension_numbers<[1], [0], [0], [1], [0, 0, 1, 1], [], []>} : vector<32x32xf32>, vector<32x1xf32>, vector<32x1xf32> -> vector<32x1xf32>
    %cst_20 = arith.constant 0.000000e+00 : f32
    %17 = vector.broadcast %cst_20 : f32 to vector<32x1xf32>
    %18 = arith.subf %17, %16 : vector<32x1xf32>
    %19 = math.exp %18 : vector<32x1xf32>
    %cst_21 = arith.constant 1.000000e+00 : f32
    %20 = vector.broadcast %cst_21 : f32 to vector<32x1xf32>
    %21 = arith.addf %20, %19 : vector<32x1xf32>
    %cst_22 = arith.constant 1.000000e+00 : f32
    %22 = vector.broadcast %cst_22 : f32 to vector<32x1xf32>
    %23 = arith.divf %22, %21 : vector<32x1xf32>
    %cst_23 = arith.constant dense<0.000000e+00> : vector<32x25xf32>
    %24 = tpu.matmul %9, %3, %cst_23 {dimension_numbers = #tpu.dot_dimension_numbers<[1], [0], [0], [1], [0, 0, 1, 1], [], []>} : vector<32x32xf32>, vector<32x25xf32>, vector<32x25xf32> -> vector<32x25xf32>
    %cst_24 = arith.constant dense<0.000000e+00> : vector<32x25xf32>
    %25 = tpu.matmul %8, %5, %cst_24 {dimension_numbers = #tpu.dot_dimension_numbers<[1], [0], [0], [1], [0, 0, 1, 1], [], []>} : vector<32x32xf32>, vector<32x25xf32>, vector<32x25xf32> -> vector<32x25xf32>
    %26 = arith.addf %24, %25 : vector<32x25xf32>
    %cst_25 = arith.constant dense<0.000000e+00> : vector<32x25xf32>
    %27 = tpu.matmul %10, %7, %cst_25 {dimension_numbers = #tpu.dot_dimension_numbers<[1], [0], [0], [1], [0, 0, 1, 1], [], []>} : vector<32x32xf32>, vector<32x25xf32>, vector<32x25xf32> -> vector<32x25xf32>
    %28 = arith.addf %26, %27 : vector<32x25xf32>
    %cst_26 = arith.constant 0.000000e+00 : f32
    %29 = vector.broadcast %cst_26 : f32 to vector<32x25xf32>
    %30 = arith.subf %29, %28 : vector<32x25xf32>
    %31 = math.exp %30 : vector<32x25xf32>
    %cst_27 = arith.constant 1.000000e+00 : f32
    %32 = vector.broadcast %cst_27 : f32 to vector<32x25xf32>
    %33 = arith.addf %32, %31 : vector<32x25xf32>
    %cst_28 = arith.constant 1.000000e+00 : f32
    %34 = vector.broadcast %cst_28 : f32 to vector<32x25xf32>
    %35 = arith.divf %34, %33 : vector<32x25xf32>
    %cst_29 = arith.constant 5.000000e-01 : f32
    %36 = vector.broadcast %cst_29 : f32 to vector<32x25xf32>
    %37 = arith.mulf %36, %35 : vector<32x25xf32>
    %cst_30 = arith.constant 5.000000e-01 : f32
    %38 = vector.broadcast %cst_30 : f32 to vector<32x1xf32>
    %39 = arith.mulf %38, %23 : vector<32x1xf32>
    %40 = vector.broadcast %39 : vector<32x1xf32> to vector<32x25xf32>
    %41 = arith.addf %37, %40 : vector<32x25xf32>
    %c0_31 = arith.constant 0 : index
    %c0_32 = arith.constant 0 : index
    %42 = vector.load %arg11[%c0_31, %c0_32] : memref<32x25xf32, #tpu.memory_space<vmem>>, vector<32x25xf32>
    tpu.vector_store %arg11[%c0_31, %c0_32], %41 {strides = array<i32>} : memref<32x25xf32, #tpu.memory_space<vmem>>, vector<32x25xf32>,
    %c0_33 = arith.constant 0 : index
    %c0_34 = arith.constant 0 : index
    %43 = vector.load %arg11[%c0_33, %c0_34] : memref<32x25xf32, #tpu.memory_space<vmem>>, vector<32x25xf32>
    %44 = arith.truncf %43 : vector<32x25xf32> to vector<32x25xbf16>
    %c0_35 = arith.constant 0 : index
    %c0_36 = arith.constant 0 : index
    %45 = vector.load %arg3[%c0_35, %c0_36] : memref<25x256xbf16, #tpu.memory_space<vmem>>, vector<25x256xbf16>
    %cst_37 = arith.constant dense<0.000000e+00> : vector<32x256xf32>
    %46 = tpu.matmul %44, %45, %cst_37 {dimension_numbers = #tpu.dot_dimension_numbers<[1], [0], [0], [1], [0, 0, 1, 1], [], []>} : vector<32x25xbf16>, vector<25x256xbf16>, vector<32x256xf32> -> vector<32x256xf32>
    %47 = arith.mulf %0, %46 : vector<32x256xf32>
    %c0_38 = arith.constant 0 : index
    %c0_39 = arith.constant 0 : index
    %48 = vector.load %arg10[%c0_38, %c0_39] : memref<32x256xf32, #tpu.memory_space<vmem>>, vector<32x256xf32>
    tpu.vector_store %arg10[%c0_38, %c0_39], %47 {strides = array<i32>} : memref<32x256xf32, #tpu.memory_space<vmem>>, vector<32x256xf32>,
    return
  }
  func.func @transform_0(%arg0: i32) -> (i32, i32) {
    %c0_i32 = arith.constant 0 : i32
    %c0_i32_0 = arith.constant 0 : i32
    return %arg0, %c0_i32 : i32, i32
  }
  func.func @transform_1(%arg0: i32) -> (i32, i32) {
    %c0_i32 = arith.constant 0 : i32
    %c0_i32_0 = arith.constant 0 : i32
    %c0_i32_1 = arith.constant 0 : i32
    return %c0_i32, %c0_i32_0 : i32, i32
  }
  func.func @transform_2(%arg0: i32) -> (i32, i32) {
    %c0_i32 = arith.constant 0 : i32
    %c0_i32_0 = arith.constant 0 : i32
    %c0_i32_1 = arith.constant 0 : i32
    return %c0_i32, %c0_i32_0 : i32, i32
  }
  func.func @transform_3(%arg0: i32) -> (i32, i32) {
    %c0_i32 = arith.constant 0 : i32
    %c0_i32_0 = arith.constant 0 : i32
    %c0_i32_1 = arith.constant 0 : i32
    return %c0_i32, %c0_i32_0 : i32, i32
  }
  func.func @transform_4(%arg0: i32) -> (i32, i32) {
    %c0_i32 = arith.constant 0 : i32
    %c0_i32_0 = arith.constant 0 : i32
    %c0_i32_1 = arith.constant 0 : i32
    return %c0_i32, %c0_i32_0 : i32, i32
  }
  func.func @transform_5(%arg0: i32) -> (i32, i32) {
    %c0_i32 = arith.constant 0 : i32
    %c0_i32_0 = arith.constant 0 : i32
    %c0_i32_1 = arith.constant 0 : i32
    return %c0_i32, %c0_i32_0 : i32, i32
  }
  func.func @transform_6(%arg0: i32) -> (i32, i32) {
    %c0_i32 = arith.constant 0 : i32
    %c0_i32_0 = arith.constant 0 : i32
    %c0_i32_1 = arith.constant 0 : i32
    return %c0_i32, %c0_i32_0 : i32, i32
  }
  func.func @transform_7(%arg0: i32) -> (i32, i32) {
    %c0_i32 = arith.constant 0 : i32
    %c0_i32_0 = arith.constant 0 : i32
    %c0_i32_1 = arith.constant 0 : i32
    return %c0_i32, %c0_i32_0 : i32, i32
  }
  func.func @transform_8(%arg0: i32) -> (i32, i32) {
    %c0_i32 = arith.constant 0 : i32
    %c0_i32_0 = arith.constant 0 : i32
    %c0_i32_1 = arith.constant 0 : i32
    return %c0_i32, %c0_i32_0 : i32, i32
  }
  func.func @transform_9(%arg0: i32) -> (i32, i32) {
    %c0_i32 = arith.constant 0 : i32
    %c0_i32_0 = arith.constant 0 : i32
    return %arg0, %c0_i32 : i32, i32
  }
}

</mosaic_0001>

<bundles_post_ra>
// kernel: tpu_custom_call.1
= control target key start
LH: loop header
LB: loop body
LE: loop exit
PB: predicated region body
PF: predicated region fallthrough
CT: control target
= control target key end

     0   :  { %s2787_s0 = inlined_call_operand.vmem [shape: f32[64,256], index: 0, kind: input, shape index: {}]   ;;  %s2788_s1 = inlined_call_operand.vmem [shape: bf16[256,25], index: 1, kind: input, shape index: {}]   ;;  %s2789_s2 = inlined_call_operand.vmem [shape: bf16[25,256], index: 2, kind: input, shape index: {}]   ;;  %s2790_s3 = inlined_call_operand.hbm [shape: f32[25,25], index: 3, kind: input, shape index: {}]   ;;  %s2791_s4 = inlined_call_operand.hbm [shape: f32[25,25], index: 4, kind: input, shape index: {}]   ;;  %s2792_s5 = inlined_call_operand.hbm [shape: f32[32,32], index: 5, kind: input, shape index: {}]   ;;  %s2793_s6 = inlined_call_operand.hbm [shape: f32[32,32], index: 6, kind: input, shape index: {}]   ;;  %s2794_s7 = inlined_call_operand.hbm [shape: f32[32,32], index: 7, kind: input, shape index: {}]   ;;  %s2795_s8 = inlined_call_operand.hbm [shape: f32[32,32], index: 8, kind: input, shape index: {}]   ;;  %s2796_s9 = inlined_call_operand.hbm [shape: f32[64,256], index: 9, kind: output, shape index: {}]  }
   0x1   :  { %2805 = sst [smem:[#allocation25_spill]] %s2791_s4 }
   0x2   :  { %14 = vsyncpa [#allocation4], 0 }
   0x3   :  { %15 = vsyncpa [#allocation7], 0 }
   0x4   :  { %16 = vsyncpa [#allocation10], 0 }
   0x5   :  { %17 = vsyncpa [#allocation13], 0 }
   0x6   :  { %18 = vsyncpa [#allocation5], 0 }
   0x7   :  { %20 = vsyncpa [#allocation5 + $0x1], 0  ;;  %s2345_s30 = smov 0   ;;  %s2347_s10 = smov 0  }
   0x8   :  { %s2349_s11 = smov 0   ;;  %s2351_s12 = smov 0  }
   0x9 LB: > { %2806 = sst [smem:[#allocation20_spill]] %s2267_s30  ;;  %s2366_s13 = sadd.s32 4294967295, %s2279_s12   ;;  %s2279_s12 = sphi %s2351_s12, %s2832_s12   ;;  %s2275_s11 = sphi %s2349_s11, %s2834_s11   ;;  %s2271_s10 = sphi %s2347_s10, %s2836_s10   ;;  %s2267_s30 = sphi %s2345_s30, %s2835_s30  }
   0xa   : > { %2807 = sst [smem:[#allocation21_spill]] %s2275_s11  ;;  %s1573_s14 = sadd.s32 4294967294, %s2279_s12  }
   0xb   : > { %s2370_s15 = sadd.s32 1, %s2279_s12   ;;  %s227_s16 = sadd.s32 1, %s2275_s11 }
   0xc   : > { %2808 = sst [smem:[#allocation22_spill]] %s2370_s15  ;;  %s224_s17 = ssub.s32 %s2279_s12, %s2370_s15 }
   0xd   : > { %p237_p0 = scmp.ne.s32.totalorder %s2275_s11, %s2271_s10  ;;  %p225_p1 = scmp.eq.s32.totalorder %s224_s17, 0 }
   0xe   : > { %p238_p2 = scmp.eq.s32.totalorder %s2366_s13, 1  ;;  %p243_p3 = scmp.ne.s32.totalorder %s2271_s10, %s2267_s30 }
   0xf   : > { %p244_p4 = scmp.eq.s32.totalorder %s1573_s14, 1  ;;  %p1574_p7 = scmp.ge.s32.totalorder %s2279_s12, 1 }
  0x10   : > { %s2381_s18 = scalar_select %p225_p1, %s2275_s11, %s227_s16  }
  0x11   : > { %p2383_p5 = por %p238_p2, %p237_p0  ;;  %p2387_p6 = por %p244_p4, %p243_p3 }
  0x12   : > { %2809 = sst [smem:[#allocation23_spill]] %s2381_s18  ;;  %p251_p8 = scmp.lt.s32.totalorder %s2279_s12, 3 }
  0x13   : > { %s2810_s19 = scalar_select %p2383_p5, 1, 0 }
  0x14   : > { %s2811_s20 = scalar_select %p2387_p6, 1, 0 }
  0x15   : > { %p2797_p9 = scmp.eq.s32.totalorder %s2366_s13, 0  ;;  %p2394_p10 = pnand %p1574_p7, %p251_p8 }
  0x16   : > { %2812 = sst [smem:[#allocation24_spill]] %s2811_s20  ;;  %s2281_s22 = smov [#allocation6]  }
  0x17   : > { %s2813_s21 = scalar_select %p2394_p10, 1, 0 }
  0x18   : > { %p1896_p11 = pneg %p2394_p10  ;;  %s282_s23 = sshll.u32 %s2281_s22, 4  ;;  %s2400_s23 = int_to_ptr.vmem [resolvable:$true] %s282_s23 }
  0x19   : > { %s2282_s25 = smov [#allocation9]   ;;  %s2283_s27 = smov [#allocation3]  }
  0x1a   : > { %p2404_p12 = pnand %p2797_p9, %p1896_p11  ;;  %s308_s26 = sshll.u32 %s2282_s25, 4  ;;  %s2408_s26 = int_to_ptr.vmem [resolvable:$true] %s308_s26 }
  0x1b   : > { %s2410_s28 = sshll.u32 %s2283_s27, 4  ;;  %s2815_s4 = sld [smem:[#allocation25_spill]]  ;;  %s270_s28 = int_to_ptr.vmem [resolvable:$true] %s2410_s28 }
  0x1c   : > { %p2420_p0 = pneg %p2404_p12 }
  0x21   : > { %s2033_s16 = scalar_lea.hbm %s2815_s4, 512 }
  0x22   : > { %p2034_p13 = scmp.ne.s32.totalorder %s2815_s4, %s2033_s16  ;;  %p2040_p3 = scmp.lt.u32.totalorder %s2033_s16, %s2815_s4 }
  0x24   : > { %p2036_p1 = pnand %p2420_p0, %p2034_p13 }
  0x26   : > { %p2037_p2 = pneg %p2036_p1 }
  0x28   : > { %p2042_p4 = pnand %p2040_p3, %p2037_p2 }
  0x2a   : > { %2045 = shalt.err (!%p2042_p4)
}
  0x2b   : > { %s2046_s29 = scalar_lea.vmem %s2400_s23, 512  ;;  %p2054_p9 = scmp.lt.s32.totalorder %s2400_s23, %s2400_s23 }
  0x2c   : > { %p2047_p7 = scmp.ne.s32.totalorder %s2400_s23, %s2046_s29  ;;  %p2055_p6 = scmp.lt.s32.totalorder %s2046_s29, %s2046_s29 }
  0x2e   : > { %p2049_p8 = pnand %p2047_p7, %p2420_p0  ;;  %p2056_p13 = por %p2055_p6, %p2054_p9 }
  0x30   : > { %p2050_p11 = pneg %p2049_p8 }
  0x32   : > { %p2057_p1 = pnand %p2056_p13, %p2050_p11 }
  0x34   : > { %2060 = shalt.err (!%p2057_p1)
}
  0x35   : > { %s2284_s14 = smov 128   ;;  %s2285_s16 = smov 8  }
  0x36   : > { %1902 = dma.hbm_to_vmem [thread:$0]  (!%p2404_p12), %s2815_s4, 512, %s2400_s23, [#allocation7], %s2284_s14, %s2284_s14, %s2285_s16  }
  0x37   : > { %s2061_s29 = scalar_lea.hbm %s2793_s6, 512 }
  0x38   : > { %p2062_p6 = scmp.ne.s32.totalorder %s2793_s6, %s2061_s29  ;;  %p2068_p3 = scmp.lt.u32.totalorder %s2061_s29, %s2793_s6 }
  0x3a   : > { %p2064_p9 = pnand %p2062_p6, %p2420_p0 }
  0x3c   : > { %p2065_p2 = pneg %p2064_p9 }
  0x3e   : > { %p2070_p4 = pnand %p2068_p3, %p2065_p2 }
  0x40   : > { %2073 = shalt.err (!%p2070_p4)
}
  0x41   : > { %s2074_s23 = scalar_lea.vmem %s2408_s26, 512  ;;  %p2082_p13 = scmp.lt.s32.totalorder %s2408_s26, %s2408_s26 }
  0x42   : > { %p2075_p7 = scmp.ne.s32.totalorder %s2408_s26, %s2074_s23  ;;  %p2083_p1 = scmp.lt.s32.totalorder %s2074_s23, %s2074_s23 }
  0x44   : > { %p2077_p8 = pnand %p2075_p7, %p2420_p0  ;;  %p2084_p6 = por %p2083_p1, %p2082_p13 }
  0x46   : > { %p2078_p11 = pneg %p2077_p8 }
  0x48   : > { %p2085_p9 = pnand %p2084_p6, %p2078_p11 }
  0x4a   : > { %2088 = shalt.err (!%p2085_p9)
}
  0x4b   : > { %1908 = dma.hbm_to_vmem [thread:$0]  (!%p2404_p12), %s2793_s6, 512, %s2408_s26, [#allocation10], %s2284_s14, %s2284_s14, %s2285_s16  }
  0x4c   : > { %s2089_s17 = scalar_lea.hbm %s2790_s3, 512 }
  0x4d   : > { %p2090_p2 = scmp.ne.s32.totalorder %s2790_s3, %s2089_s17  ;;  %p2096_p7 = scmp.lt.u32.totalorder %s2089_s17, %s2790_s3 }
  0x4f   : > { %p2092_p3 = pnand %p2090_p2, %p2420_p0 }
  0x51   : > { %p2093_p4 = pneg %p2092_p3 }
  0x53   : > { %p2098_p8 = pnand %p2096_p7, %p2093_p4 }
  0x55   : > { %2101 = shalt.err (!%p2098_p8)
}
  0x56   : > { %s2102_s23 = scalar_lea.vmem %s270_s28, 512  ;;  %p2110_p6 = scmp.lt.s32.totalorder %s270_s28, %s270_s28 }
  0x57   : > { %p2103_p11 = scmp.ne.s32.totalorder %s270_s28, %s2102_s23  ;;  %p2111_p9 = scmp.lt.s32.totalorder %s2102_s23, %s2102_s23 }
  0x59   : > { %p2105_p13 = pnand %p2103_p11, %p2420_p0  ;;  %p2112_p5 = por %p2111_p9, %p2110_p6 }
  0x5b   : > { %p2106_p1 = pneg %p2105_p13 }
  0x5d   : > { %p2113_p10 = pnand %p2112_p5, %p2106_p1 }
  0x5f   : > { %2116 = shalt.err (!%p2113_p10)
}
  0x60   : > { %1899 = dma.hbm_to_vmem [thread:$0]  (!%p2404_p12), %s2790_s3, 512, %s270_s28, [#allocation4], %s2284_s14, %s2284_s14, %s2285_s16  }
  0x61   : > { %s2286_s11 = smov [#allocation8]   ;;  %s2287_s20 = smov [#allocation11]  }
  0x62   : > { %s295_s15 = sshll.u32 %s2286_s11, 4  ;;  %s321_s17 = sshll.u32 %s2287_s20, 4  ;;  %s296_s15 = int_to_ptr.vmem [resolvable:$true] %s295_s15  ;;  %s322_s17 = int_to_ptr.vmem [resolvable:$true] %s321_s17 }
  0x63   : > { %s2117_s27 = scalar_lea.hbm %s2792_s5, 512 }
  0x64   : > { %p2118_p5 = scmp.ne.s32.totalorder %s2792_s5, %s2117_s27  ;;  %p2124_p3 = scmp.lt.u32.totalorder %s2117_s27, %s2792_s5 }
  0x66   : > { %p2120_p10 = pnand %p2118_p5, %p2420_p0 }
  0x68   : > { %p2121_p2 = pneg %p2120_p10 }
  0x6a   : > { %p2126_p4 = pnand %p2124_p3, %p2121_p2 }
  0x6c   : > { %2129 = shalt.err (!%p2126_p4)
}
  0x6d   : > { %s2130_s28 = scalar_lea.vmem %s296_s15, 512  ;;  %p2138_p13 = scmp.lt.s32.totalorder %s296_s15, %s296_s15 }
  0x6e   : > { %p2131_p7 = scmp.ne.s32.totalorder %s296_s15, %s2130_s28  ;;  %p2139_p1 = scmp.lt.s32.totalorder %s2130_s28, %s2130_s28 }
  0x70   : > { %p2133_p8 = pnand %p2131_p7, %p2420_p0  ;;  %p2140_p6 = por %p2139_p1, %p2138_p13 }
  0x72   : > { %p2134_p11 = pneg %p2133_p8 }
  0x74   : > { %p2141_p9 = pnand %p2140_p6, %p2134_p11 }
  0x76   : > { %2144 = shalt.err (!%p2141_p9)
}
  0x77   : > { %1905 = dma.hbm_to_vmem [thread:$0]  (!%p2404_p12), %s2792_s5, 512, %s296_s15, [#allocation7], %s2284_s14, %s2284_s14, %s2285_s16  }
  0x78   : > { %s2145_s22 = scalar_lea.hbm %s2794_s7, 512 }
  0x79   : > { %p2146_p5 = scmp.ne.s32.totalorder %s2794_s7, %s2145_s22  ;;  %p2152_p3 = scmp.lt.u32.totalorder %s2145_s22, %s2794_s7 }
  0x7b   : > { %p2148_p10 = pnand %p2146_p5, %p2420_p0 }
  0x7d   : > { %p2149_p2 = pneg %p2148_p10 }
  0x7f   : > { %p2154_p4 = pnand %p2152_p3, %p2149_p2 }
  0x81   : > { %2157 = shalt.err (!%p2154_p4)
}
  0x82   : > { %s2158_s26 = scalar_lea.vmem %s322_s17, 512  ;;  %p2166_p13 = scmp.lt.s32.totalorder %s322_s17, %s322_s17 }
  0x83   : > { %p2159_p7 = scmp.ne.s32.totalorder %s322_s17, %s2158_s26  ;;  %p2167_p1 = scmp.lt.s32.totalorder %s2158_s26, %s2158_s26 }
  0x85   : > { %p2161_p8 = pnand %p2159_p7, %p2420_p0  ;;  %p2168_p6 = por %p2167_p1, %p2166_p13 }
  0x87   : > { %p2162_p11 = pneg %p2161_p8 }
  0x89   : > { %p2169_p9 = pnand %p2168_p6, %p2162_p11 }
  0x8b   : > { %2172 = shalt.err (!%p2169_p9)
}
  0x8c   : > { %1911 = dma.hbm_to_vmem [thread:$0]  (!%p2404_p12), %s2794_s7, 512, %s322_s17, [#allocation10], %s2284_s14, %s2284_s14, %s2285_s16  }
  0x8d   : > { %s2288_s4 = smov [#allocation12]   ;;  %s2173_s22 = scalar_lea.hbm %s2795_s8, 512 }
  0x8e   : > { %s334_s30 = sshll.u32 %s2288_s4, 4  ;;  %p2174_p5 = scmp.ne.s32.totalorder %s2795_s8, %s2173_s22  ;;  %s335_s30 = int_to_ptr.vmem [resolvable:$true] %s334_s30 }
  0x8f   : > { %p2180_p3 = scmp.lt.u32.totalorder %s2173_s22, %s2795_s8 }
  0x90   : > { %p2176_p10 = pnand %p2174_p5, %p2420_p0 }
  0x92   : > { %p2177_p2 = pneg %p2176_p10 }
  0x94   : > { %p2182_p4 = pnand %p2180_p3, %p2177_p2 }
  0x96   : > { %2185 = shalt.err (!%p2182_p4)
}
  0x97   : > { %s2186_s17 = scalar_lea.vmem %s335_s30, 512  ;;  %p2194_p13 = scmp.lt.s32.totalorder %s335_s30, %s335_s30 }
  0x98   : > { %p2187_p7 = scmp.ne.s32.totalorder %s335_s30, %s2186_s17  ;;  %p2195_p1 = scmp.lt.s32.totalorder %s2186_s17, %s2186_s17 }
  0x9a   : > { %p2189_p8 = pnand %p2187_p7, %p2420_p0  ;;  %p2196_p6 = por %p2195_p1, %p2194_p13 }
  0x9c   : > { %p2190_p11 = pneg %p2189_p8 }
  0x9e   : > { %p2197_p9 = pnand %p2196_p6, %p2190_p11 }
  0xa0   : > { %2200 = shalt.err (!%p2197_p9)
}
  0xa1   : > { %1914 = dma.hbm_to_vmem [thread:$0]  (!%p2404_p12), %s2795_s8, 512, %s335_s30, [#allocation13], %s2284_s14, %s2284_s14, %s2285_s16  }
  0xa2   : > { %p2817_p5 = scmp.ne.s32.totalorder %s2813_s21, 0 }
  0xa3   : > { %p2818_p0 = scmp.eq.s32.totalorder (!%p2817_p5), %s2366_s13, 0 }
  0xa4   : > { %360 = sbr.rel (%p2817_p5) target bundleno = 1215 (0x4bf), region = 56 }
  0xab   : > { %2246 = dma.done.wait (%p2818_p0), [#allocation4], 512   ;;  %p2819_p10 = pmov %p2818_p0 }
  0xac   : > { %p2820_p2 = pmov %p2818_p0 }
  0xad   : > { %2248 = vsyncadd (%p2819_p10), [#allocation4], 4294966784 }
  0xae   : > { %2250 = dma.done.wait (%p2820_p2), [#allocation7], 1024   ;;  %p2821_p3 = pmov %p2818_p0 }
  0xaf   : > { %p2822_p4 = pmov %p2818_p0 }
  0xb0   : > { %2252 = vsyncadd (%p2821_p3), [#allocation7], 4294966272 }
  0xb1   : > { %2254 = dma.done.wait (%p2822_p4), [#allocation10], 1024   ;;  %p2823_p12 = pmov %p2818_p0 }
  0xb2   : > { %p2824_p7 = pmov %p2818_p0 }
  0xb3   : > { %2256 = vsyncadd (%p2823_p12), [#allocation10], 4294966272 }
  0xb4   : > { %2258 = dma.done.wait (%p2824_p7), [#allocation13], 512   ;;  %p2825_p8 = pmov %p2818_p0 }
  0xb5   : > { %s1590_s18 = sshll.u32 %s2366_s13, 2  ;;  %v1979_v0 = vld [vmem:[%s2788_s1 + $0x40] sm:$0xff]   ;;  %v1981_v2 = vld [vmem:[%s2788_s1 + $0x48] sm:$0xff]   ;;  %v1983_v4 = vld [vmem:[%s2788_s1 + $0x50] sm:$0xff]   ;;  %vm632_vm0 = vcmask 1040384   ;;  %vm2289_vm1 = vmmov 1  }
  0xb6   : > { %2260 = vsyncadd (%p2825_p8), [#allocation13], 4294966784  ;;  %v1980_v1 = vld [vmem:[%s2788_s1] sm:$0xff]   ;;  %1650 = vmatprep.subr.bf16.mxu0 %v1979_v0  ;;  %p418_p11 = scmp.lt.s32.totalorder %s1590_s18, 7  ;;  %v1982_v3 = vld [vmem:[%s2788_s1 + $0x8] sm:$0xff]   ;;  %vm619_vm3 = vcmask 203776  }
  0xb7   : > { %1651 = vmatpush3.bf16.msra.mxu0 %v1980_v1  ;;  %v1984_v5 = vld [vmem:[%s2788_s1 + $0x10] sm:$0xff]   ;;  %v1985_v6 = vld [vmem:[%s2788_s1 + $0x58] sm:$0xff]   ;;  %v1987_v8 = vld [vmem:[%s2788_s1 + $0x60] sm:$0xff]   ;;  %vm846_vm4 = vcmask 261120   ;;  %vm1357_vm5 = vcmask 1043456   ;;  %vm1358_vm6 = vcmask 1044480  }
  0xb8   : > { %1652 = vmatprep.subr.bf16.mxu0 %v1981_v2  ;;  %s2838_s18 = smov (!%p418_p11, %s1590_s18), 7  ;;  %v1986_v7 = vld [vmem:[%s2788_s1 + $0x18] sm:$0xff]   ;;  %v1988_v9 = vld [vmem:[%s2788_s1 + $0x20] sm:$0xff]   ;;  %v1989_v10 = vld [vmem:[%s2788_s1 + $0x68] sm:$0xff]   ;;  %s414_s20 = sand.u32 1, %s2271_s10  }
  0xb9   : > { %s1647_s17 = sshll.u32 %s2838_s18, 4  ;;  %v1990_v14 = vld [vmem:[%s2788_s1 + $0x28] sm:$0xff]   ;;  %v615_v15 = vld [vmem:[#allocation3] sm:$0xff]  ;;  %v1991_v17 = vld [vmem:[%s2788_s1 + $0x70] sm:$0xff]   ;;  %s1589_s22 = sshll.u32 %s414_s20, 6 }
  0xba   : > { %s2604_s28 = scalar_lea.vmem %s2787_s0, %s1647_s17  ;;  %v616_v16 = vld [vmem:[#allocation3 + $0x8] sm:$0xff]  ;;  %v1992_v19 = vld [vmem:[%s2788_s1 + $0x30] sm:$0xff]   ;;  %v1993_v20 = vld [vmem:[%s2788_s1 + $0x78] sm:$0xff]   ;;  %s416_s25 = scalar_lea.vmem [#allocation14], %s1589_s22 }
  0xbb   : > { %1653 = vmatpush3.bf16.msra.mxu0 %v1982_v3  ;;  %v2613_v11 = vld [vmem:[%s2604_s28 + $0x8] sm:$0xff]  ;;  %v2616_v12 = vld [vmem:[%s2604_s28 + $0x18] sm:$0xff]  ;;  %v1810_v18 = vpack.c.bf16 %v616_v16, %v615_v15  ;;  %v2636_v22 = vld [vmem:[%s2604_s28] sm:$0xff]  ;;  %s1451_s27 = sshll.u32 %s416_s25, 4  ;;  %s1649_s29 = sshll.u32 %s2366_s13, 10  ;;  %s2735_s27 = int_to_ptr.vmem [resolvable:$true] %s1451_s27 }
  0xbc   : > { %1654 = vmatprep.subr.bf16.mxu0 %v1983_v4  ;;  %v435_v13 = vpack.c.bf16 %v2616_v12, %v2613_v11  ;;  %v1994_v21 = vld [vmem:[%s2788_s1 + $0x38] sm:$0xff]   ;;  %v2639_v23 = vld [vmem:[%s2604_s28 + $0x10] sm:$0xff]  ;;  %v2642_v24 = vld [vmem:[%s2604_s28 + $0x28] sm:$0xff]  ;;  %s2741_s13 = scalar_lea.hbm %s2796_s9, %s1649_s29  ;;  %s2746_s26 = scalar_lea.sflag [#allocation5], %s414_s20 }
  0xbd   : > { %1811 = vmatprep.subr.bf16.mxu1 %v1810_v18  ;;  %v2645_v25 = vld [vmem:[%s2604_s28 + $0x38] sm:$0xff]  ;;  %v434_v26 = vpack.c.bf16 %v2639_v23, %v2636_v22  ;;  %v2652_v28 = vld [vmem:[%s2604_s28 + $0x20] sm:$0xff]  ;;  %v2655_v29 = vld [vmem:[%s2604_s28 + $0x30] sm:$0xff]  ;;  %s2201_s15 = scalar_lea.vmem %s2735_s27, 1024  ;;  %p2828_p1 = scmp.ne.s32.totalorder %s2810_s19, 0 }
  0xbe   : > { %598 = vmatprep.mubr.bf16.mxu0 %v435_v13  ;;  %1813 = vmatpush3.bf16.msra.mxu1 %v1810_v18  ;;  %v437_v27 = vpack.c.bf16 %v2645_v25, %v2642_v24  ;;  %v436_v30 = vpack.c.bf16 %v2655_v29, %v2652_v28  ;;  %v617_v31 = vld [vmem:[#allocation3 + $0x10] sm:$0xff]  ;;  %v618_v32 = vld [vmem:[#allocation3 + $0x18] sm:$0x1]  ;;  %vm2659_vm2 = vmpackc.low %vm632_vm0, %vm2289_vm1  ;;  %p2202_p13 = scmp.ne.s32.totalorder %s2735_s27, %s2201_s15  ;;  %s2292_s21 = smov [#allocation14]  }
  0xbf   : > { %1655 = vmatpush3.bf16.msra.mxu0 %v1984_v5  ;;  %v1814_v33 = vpack.c.bf16 %v618_v32, %v617_v31  ;;  %v721_v35 = vld [vmem:[#allocation6] sm:$0xff]  ;;  %v722_v36 = vld [vmem:[#allocation6 + $0x8] sm:$0xff]  ;;  %v723_v40 = vld [vmem:[#allocation6 + $0x10] sm:$0xff]  ;;  %s2205_s24 = sshll.u32 %s2292_s21, 4  ;;  %s2206_s24 = int_to_ptr.vmem [resolvable:$false] %s2205_s24 }
  0xc0   : > { %1656 = vmatprep.subr.bf16.mxu0 %v1985_v6  ;;  %v1820_v37 = vpack.c.bf16 %v722_v36, %v721_v35  ;;  %v724_v41 = vld [vmem:[#allocation6 + $0x18] sm:$0x1]  ;;  %v825_v59 = vld [vmem:[#allocation12] sm:$0xff]  ;;  %v826_v6 = vld [vmem:[#allocation12 + $0x8] sm:$0xff]  ;;  %p2203_p6 = pnand %p2202_p13, %p2828_p1  ;;  %s2207_s14 = scalar_lea.vmem %s2206_s24, 2048 }
  0xc1   : > { %1816 = vmatprep.subr.msk.bf16.mxu1 %vm2659_vm2, %v1814_v33  ;;  %v1824_v47 = vpack.c.bf16 %v724_v41, %v723_v40  ;;  %v816_v31 = vld [vmem:[#allocation8 + $0x18] sm:$0xff]  ;;  %v818_v34 = vld [vmem:[#allocation9 + $0x8] sm:$0xff]  ;;  %v819_v35 = vld [vmem:[#allocation9 + $0x10] sm:$0xff]  ;;  %v2290_v41 = vmov 0   ;;  %p2208_p5 = scmp.lt.s32.totalorder %s2735_s27, %s2206_s24  ;;  %p2209_p0 = scmp.lt.s32.totalorder %s2207_s14, %s2201_s15 }
  0xc2   : > { %1819 = vmatpush3.bf16.msk.msra.mxu1 %vm2659_vm2, %v1814_v33  ;;  %v817_v33 = vld [vmem:[#allocation9] sm:$0xff]  ;;  %v820_v36 = vld [vmem:[#allocation9 + $0x18] sm:$0xff]  ;;  %1978 = vset.pattern.permute.xlu1 %v2290_v41  ;;  %p2204_p9 = pneg %p2203_p6 }
  0xc3   : > { %1657 = vmatpush3.bf16.msra.mxu0 %v1986_v7  ;;  %1821 = vmatprep.subr.bf16.mxu1 %v1820_v37  ;;  %v827_v7 = vld [vmem:[#allocation12 + $0x10] sm:$0xff]  ;;  %v824_v40 = vld [vmem:[#allocation11 + $0x18] sm:$0xff]  ;;  %p2210_p10 = por %p2209_p0, %p2208_p5 }
  0xc4   : > { %1658 = vmatprep.subr.bf16.mxu0 %v1987_v8  ;;  %v828_v8 = vld [vmem:[#allocation12 + $0x18] sm:$0xff]  ;;  %1977 = vset.pattern.permute.xlu0 %v2290_v41 }
  0xc5   : > { %p2211_p2 = pnand %p2210_p10, %p2204_p9 }
  0xc7   : > { %1659 = vmatpush3.bf16.msra.mxu0 %v1988_v9  ;;  %v813_v9 = vld [vmem:[#allocation8] sm:$0xff] }
  0xc8   : > { %1660 = vmatprep.subr.bf16.mxu0 %v1989_v10 }
  0xcb   : > { %1661 = vmatpush3.bf16.msra.mxu0 %v1990_v14 }
  0xcc   : > { %1662 = vmatprep.subr.bf16.mxu0 %v1991_v17 }
  0xcf   : > { %1663 = vmatpush3.bf16.msra.mxu0 %v1992_v19 }
  0xd0   : > { %1664 = vmatprep.subr.bf16.mxu0 %v1993_v20  ;;  %v814_v20 = vld [vmem:[#allocation8 + $0x8] sm:$0xff] }
  0xd3   : > { %1665 = vmatpush3.bf16.msra.mxu0 %v1994_v21 }
  0xd6   : > { %599 = vmatmul.mubr.bf16.vlgmr.msra.gmra.mrb[0].mxu0 %v434_v26  ;;  %v815_v26 = vld [vmem:[#allocation8 + $0x10] sm:$0xff] }
  0xd7   : > { %606 = vmatprep.mubr.bf16.mxu0 %v437_v27 }
  0xde   : > { %607 = vmatmul.mubr.bf16.gmra.mrb[4].mxu0 %v436_v30 }
  0xdf   : > { %1399 = vmatprep.mubr.bf16.mxu0 %v2290_v41 }
 0x1a9   : > { %v1666_v38 = vpop.f32.mrb[0].mxu0 }
 0x1aa   : > { %v1667_v39 = vpop.f32.mrb[1].mxu0 }
 0x1ab   : > { %v1668_v42 = vadd.f32 %v1667_v39, %v1666_v38  ;;  %v1669_v43 = vpop.f32.mrb[2].mxu0  ;;  %v822_v38 = vld [vmem:[#allocation11 + $0x8] sm:$0xff]  ;;  %v823_v39 = vld [vmem:[#allocation11 + $0x10] sm:$0xff] }
 0x1ac   : > { %v1670_v44 = vpop.f32.mrb[3].mxu0 }
 0x1ad   : > { %v1671_v45 = vadd.f32 %v1670_v44, %v1669_v43  ;;  %1734 = vmatprep.mubr.msk.f32.mxu1 %vm619_vm3, %v1668_v42  ;;  %v829_v46 = vsel %vm619_vm3, %v1668_v42, 0.0  ;;  %v1997_v43 = vld [vmem:[%s2789_s2 + $0x4] ss:$8 sps:$4 sm:$0xff]  }
 0x1ae   : > { %830 = vadd.xlane.f32.xlu0 %v829_v46  ;;  %1367 = vmatprep.subr.bf16.mxu0 %v1997_v43 }
 0x1af   : > { %1735 = vmatmul.mubr.msk.f32.vlgmr.msra.gmra.mrb[0].mxu1 %vm619_vm3, %v1671_v45  ;;  %v2670_v48 = vpack.c.bf16 %v1671_v45, %v1668_v42  ;;  %v832_v50 = vsel %vm619_vm3, %v1671_v45, 0.0 }
 0x1b0   : > { %1823 = vmatpush3.bf16.msra.mxu1 %v1820_v37  ;;  %v821_v37 = vld [vmem:[#allocation11] sm:$0xff] }
 0x1b1   : > { %v1672_v49 = vpop.f32.mrb[4].mxu0  ;;  %1826 = vmatprep.subr.msk.bf16.mxu1 %vm2659_vm2, %v1824_v47 }
 0x1b2   : > { %v1673_v51 = vpop.f32.mrb[5].mxu0  ;;  %833 = vadd.xlane.f32.xlu0 %v832_v50 }
 0x1b3   : > { %v1674_v52 = vadd.f32 %v1673_v51, %v1672_v49  ;;  %v1675_v53 = vpop.f32.mrb[6].mxu0 }
 0x1b4   : > { %v1676_v54 = vpop.f32.mrb[7].mxu0  ;;  %1829 = vmatpush3.bf16.msk.msra.mxu1 %vm2659_vm2, %v1824_v47 }
 0x1b5   : > { %v1677_v55 = vadd.f32 %v1676_v54, %v1675_v53  ;;  %1737 = vmatprep.mubr.msk.f32.mxu1 %vm619_vm3, %v1674_v52  ;;  %v835_v56 = vsel %vm619_vm3, %v1674_v52, 0.0 }
 0x1b6   : > { %836 = vadd.xlane.f32.xlu1 %v835_v56 }
 0x1b7   : > { %1738 = vmatmul.mubr.msk.f32.gmra.mrb[2].mxu1 %vm619_vm3, %v1677_v55  ;;  %v1850_v57 = vpack.c.bf16 %v1677_v55, %v1674_v52  ;;  %v838_v58 = vsel %vm619_vm3, %v1677_v55, 0.0 }
 0x1b8   : > { %1748 = vmatprep.mubr.msk.f32.mxu1 %vm619_vm3, %v1668_v42  ;;  %v1995_v42 = vld [vmem:[%s2789_s2] ss:$8 sps:$4 sm:$0xff]  }
 0x1b9   : > { %1368 = vmatpush1.bf16.msra.mxu0 %v1995_v42 }
 0x1ba   : > { %839 = vadd.xlane.f32.xlu1 %v838_v58 }
 0x1bb   : > { %1749 = vmatmul.mubr.msk.f32.vlgmr.msra.gmra.mrb[4].mxu1 %vm619_vm3, %v1671_v45 }
 0x1bc   : > { %1751 = vmatprep.mubr.msk.f32.mxu1 %vm619_vm3, %v1674_v52 }
 0x1bf   : > { %1752 = vmatmul.mubr.msk.f32.gmra.mrb[6].mxu1 %vm619_vm3, %v1677_v55 }
 0x1c0   : > { %1762 = vmatprep.mubr.msk.f32.mxu1 %vm846_vm4, %v825_v59 }
 0x23b   : > { %v831_v60 = vpop.xlane.xlu0 %830 }
 0x23c   : > { %v842_v62 = vmul.f32 0.04, %v831_v60 }
 0x23f   : > { %v834_v61 = vpop.xlane.xlu0 %833 }
 0x240   : > { %v843_v63 = vmul.f32 0.04, %v834_v61 }
 0x242   : > { %v1830_v0 = vpack.c.bf16 %v843_v63, %v842_v62 }
 0x243   : > { %v837_v1 = vpop.xlane.xlu1 %836 }
 0x244   : > { %1831 = vmatprep.subr.bf16.mxu1 %v1830_v0  ;;  %v844_v3 = vmul.f32 0.04, %v837_v1 }
 0x245   : > { %1833 = vmatpush3.bf16.msra.mxu1 %v1830_v0 }
 0x247   : > { %v840_v2 = vpop.xlane.xlu1 %839 }
 0x248   : > { %v845_v4 = vmul.f32 0.04, %v840_v2 }
 0x24a   : > { %v1834_v5 = vpack.c.bf16 %v845_v4, %v844_v3 }
 0x24c   : > { %1835 = vmatprep.subr.bf16.mxu1 %v1834_v5 }
 0x24d   : > { %1837 = vmatpush3.bf16.msra.mxu1 %v1834_v5 }
 0x250   : > { %1763 = vmatmul.mubr.msk.f32.vlgmr.msra.gmra.mrb[8].mxu1 %vm846_vm4, %v826_v6 }
 0x251   : > { %1765 = vmatprep.mubr.msk.f32.mxu1 %vm846_vm4, %v827_v7  ;;  %v2000_v7 = vld [vmem:[%s2789_s2 + $0x14] ss:$8 sps:$4 sm:$0x1f]  }
 0x254   : > { %1766 = vmatmul.mubr.msk.f32.gmra.mrb[10].mxu1 %vm846_vm4, %v828_v8  ;;  %v2291_v8 = vmov 65535  }
 0x255   : > { %1776 = vmatprep.mubr.msk.f32.mxu1 %vm846_vm4, %v813_v9  ;;  %v1359_v9 = vsel %vm1357_vm5, 4294967295, %v2291_v8 }
 0x282   : > { %v1736_v10 = vpop.f32.mrb[0].mxu1 }
 0x283   : > { %v702_v13 = vpop.f32.mrb[1].mxu1 }
 0x284   : > { %v1838_v14 = vpack.c.bf16 %v1736_v10, %v702_v13  ;;  %v1998_v10 = vld [vmem:[%s2789_s2 + $0x10] ss:$8 sps:$4 sm:$0x1f]   ;;  %v1360_v13 = vsel %vm1358_vm6, %v1359_v9, 0 }
 0x286   : > { %1839 = vmatprep.subr.bf16.mxu1 %v1838_v14 }
 0x287   : > { %1841 = vmatpush3.bf16.msra.mxu1 %v1838_v14 }
 0x28a   : > { %v1739_v15 = vpop.f32.mrb[2].mxu1 }
 0x28b   : > { %v712_v16 = vpop.f32.mrb[3].mxu1 }
 0x28c   : > { %v1842_v17 = vpack.c.bf16 %v1739_v15, %v712_v16  ;;  %v1365_v15 = vand.u32 %v2000_v7, %v1360_v13  ;;  %v1362_v16 = vand.u32 %v1998_v10, %v1360_v13 }
 0x28e   : > { %v1750_v18 = vpop.f32.mrb[4].mxu1  ;;  %1843 = vmatprep.subr.bf16.mxu1 %v1842_v17  ;;  %1369 = vmatprep.subr.bf16.mxu0 %v1365_v15 }
 0x28f   : > { %v794_v19 = vpop.f32.mrb[5].mxu1  ;;  %1845 = vmatpush3.bf16.msra.mxu1 %v1842_v17  ;;  %1370 = vmatpush1.bf16.msra.mxu0 %v1362_v16 }
 0x290   : > { %v1854_v21 = vpack.c.bf16 %v1750_v18, %v794_v19  ;;  %1847 = vmatprep.subr.bf16.mxu1 %v2670_v48 }
 0x292   : > { %v1753_v27 = vpop.f32.mrb[6].mxu1  ;;  %1777 = vmatmul.mubr.msk.f32.vlgmr.msra.gmra.mrb[12].mxu1 %vm846_vm4, %v814_v20 }
 0x293   : > { %v804_v30 = vpop.f32.mrb[7].mxu1  ;;  %1849 = vmatpush3.bf16.msra.mxu1 %v2670_v48  ;;  %1779 = vmatprep.mubr.msk.f32.mxu1 %vm846_vm4, %v815_v26 }
 0x294   : > { %v1858_v32 = vpack.c.bf16 %v1753_v27, %v804_v30  ;;  %1851 = vmatprep.subr.bf16.mxu1 %v1850_v57 }
 0x296   : > { %1780 = vmatmul.mubr.msk.f32.gmra.mrb[14].mxu1 %vm846_vm4, %v816_v31 }
 0x297   : > { %1853 = vmatpush3.bf16.msra.mxu1 %v1850_v57  ;;  %1790 = vmatprep.mubr.msk.f32.mxu1 %vm846_vm4, %v817_v33 }
 0x298   : > { %1855 = vmatprep.subr.bf16.mxu1 %v1854_v21 }
 0x29a   : > { %1791 = vmatmul.mubr.msk.f32.vlgmr.msra.gmra.mrb[12].mxu1 %vm846_vm4, %v818_v34 }
 0x29b   : > { %1857 = vmatpush3.bf16.msra.mxu1 %v1854_v21  ;;  %1793 = vmatprep.mubr.msk.f32.mxu1 %vm846_vm4, %v819_v35 }
 0x29c   : > { %1859 = vmatprep.subr.bf16.mxu1 %v1858_v32 }
 0x29e   : > { %1794 = vmatmul.mubr.msk.f32.gmra.mrb[14].mxu1 %vm846_vm4, %v820_v36 }
 0x29f   : > { %1861 = vmatpush3.bf16.msra.mxu1 %v1858_v32  ;;  %1804 = vmatprep.mubr.msk.f32.mxu1 %vm846_vm4, %v821_v37 }
 0x2a2   : > { %1805 = vmatmul.mubr.msk.f32.vlgmr.msra.gmra.mrb[12].mxu1 %vm846_vm4, %v822_v38 }
 0x2a3   : > { %1807 = vmatprep.mubr.msk.f32.mxu1 %vm846_vm4, %v823_v39 }
 0x2a6   : > { %1808 = vmatmul.mubr.msk.f32.gmra.mrb[14].mxu1 %vm846_vm4, %v824_v40 }
 0x323   : > { %v1764_v44 = vpop.f32.mrb[8].mxu1 }
 0x324   : > { %v945_v45 = vsub.f32 0.0, %v1764_v44  ;;  %v925_v46 = vpop.f32.mrb[9].mxu1 }
 0x325   : > { %v944_v47 = vsub.f32 0.0, %v925_v46 }
 0x326   : > { %v950_v48 = vmul.f32 1.442695, %v945_v45 }
 0x327   : > { %v948_v49 = vmul.f32 1.442695, %v944_v47  ;;  %v1767_v50 = vpop.f32.mrb[10].mxu1 }
 0x328   : > { %2001 = vpow2.f32 %v950_v48  ;;  %v947_v51 = vsub.f32 0.0, %v1767_v50  ;;  %v935_v52 = vpop.f32.mrb[11].mxu1 }
 0x329   : > { %2003 = vpow2.f32 %v948_v49  ;;  %v946_v53 = vsub.f32 0.0, %v935_v52 }
 0x32a   : > { %v954_v54 = vmul.f32 1.442695, %v947_v51 }
 0x32b   : > { %v952_v55 = vmul.f32 1.442695, %v946_v53 }
 0x32c   : > { %2005 = vpow2.f32 %v954_v54 }
 0x32d   : > { %2007 = vpow2.f32 %v952_v55 }
 0x332   : > { %v2002_v56 = vpop.eup %2001 }
 0x333   : > { %v2004_v57 = vpop.eup %2003  ;;  %v957_v58 = vadd.f32 1.0, %v2002_v56 }
 0x334   : > { %v956_v59 = vadd.f32 1.0, %v2004_v57 }
 0x335   : > { %2009 = vrcp.f32 %v957_v58 }
 0x336   : > { %v2006_v60 = vpop.eup %2005  ;;  %2011 = vrcp.f32 %v956_v59 }
 0x337   : > { %v2008_v61 = vpop.eup %2007  ;;  %v959_v62 = vadd.f32 1.0, %v2006_v60 }
 0x338   : > { %v958_v63 = vadd.f32 1.0, %v2008_v61 }
 0x33a   : > { %2013 = vrcp.f32 %v958_v63 }
 0x33b   : > { %2015 = vrcp.f32 %v959_v62 }
 0x33f   : > { %v2010_v0 = vpop.eup %2009 }
 0x340   : > { %v2012_v1 = vpop.eup %2011  ;;  %v1292_v2 = vmul.f32 0.5, %v2010_v0 }
 0x341   : > { %v1291_v3 = vmul.f32 0.5, %v2012_v1 }
 0x342   : > { %1302 = vperm.xlu1 %1978, %v1292_v2  }
 0x343   : > { %1297 = vperm.xlu0 %1977, %v1291_v3  }
 0x344   : > { %v2014_v4 = vpop.eup %2013 }
 0x345   : > { %v1293_v5 = vmul.f32 0.5, %v2014_v4  ;;  %v2016_v6 = vpop.eup %2015 }
 0x346   : > { %v1294_v14 = vmul.f32 0.5, %v2016_v6 }
 0x347   : > { %1307 = vperm.xlu1 %1978, %v1293_v5  }
 0x34b   : > { %1312 = vperm.xlu1 %1978, %v1294_v14  }
 0x375   : > { %v1806_v17 = vpop.f32.mrb[12].mxu1 }
 0x376   : > { %v1240_v18 = vpop.f32.mrb[13].mxu1  ;;  %v1264_v21 = vsub.f32 0.0, %v1806_v17 }
 0x377   : > { %v1263_v26 = vsub.f32 0.0, %v1240_v18 }
 0x378   : > { %v1269_v27 = vmul.f32 1.442695, %v1264_v21 }
 0x379   : > { %v1809_v19 = vpop.f32.mrb[14].mxu1  ;;  %v1267_v30 = vmul.f32 1.442695, %v1263_v26 }
 0x37a   : > { %v1250_v20 = vpop.f32.mrb[15].mxu1  ;;  %2017 = vpow2.f32 %v1269_v27  ;;  %v1266_v32 = vsub.f32 0.0, %v1809_v19 }
 0x37b   : > { %v1265_v31 = vsub.f32 0.0, %v1250_v20  ;;  %2019 = vpow2.f32 %v1267_v30 }
 0x37c   : > { %v1273_v34 = vmul.f32 1.442695, %v1266_v32 }
 0x37d   : > { %v1271_v33 = vmul.f32 1.442695, %v1265_v31 }
 0x37f   : > { %2021 = vpow2.f32 %v1271_v33 }
 0x380   : > { %2023 = vpow2.f32 %v1273_v34 }
 0x384   : > { %v2018_v35 = vpop.eup %2017 }
 0x385   : > { %v2020_v36 = vpop.eup %2019  ;;  %v1276_v37 = vadd.f32 1.0, %v2018_v35 }
 0x386   : > { %v1275_v38 = vadd.f32 1.0, %v2020_v36 }
 0x387   : > { %2025 = vrcp.f32 %v1276_v37 }
 0x388   : > { %2027 = vrcp.f32 %v1275_v38 }
 0x389   : > { %v2022_v39 = vpop.eup %2021 }
 0x38a   : > { %v1277_v40 = vadd.f32 1.0, %v2022_v39  ;;  %v2024_v42 = vpop.eup %2023 }
 0x38b   : > { %v1278_v43 = vadd.f32 1.0, %v2024_v42 }
 0x38c   : > { %2029 = vrcp.f32 %v1277_v40 }
 0x38d   : > { %2031 = vrcp.f32 %v1278_v43 }
 0x391   : > { %v2026_v44 = vpop.eup %2025 }
 0x392   : > { %v2028_v45 = vpop.eup %2027  ;;  %v1288_v46 = vmul.f32 0.5, %v2026_v44 }
 0x393   : > { %v1287_v48 = vmul.f32 0.5, %v2028_v45 }
 0x396   : > { %v2030_v49 = vpop.eup %2029 }
 0x397   : > { %v1289_v53 = vmul.f32 0.5, %v2030_v49  ;;  %v2032_v54 = vpop.eup %2031 }
 0x398   : > { %v1290_v57 = vmul.f32 0.5, %v2032_v54 }
 0x3c1   : > { %v1303_v47 = vpop.permute.xlu1 %1302 }
 0x3c2   : > { %v1316_v50 = vadd.f32 %v1303_v47, %v1288_v46  ;;  %v1298_v51 = vpop.permute.xlu0 %1297 }
 0x3c3   : > { %v1315_v52 = vadd.f32 %v1298_v51, %v1287_v48 }
 0x3c4   : > { %1320 = vst.msk [vmem:[#allocation2 + $0x8] sm:$0xff] %vm619_vm3, %v1316_v50 }
 0x3c5   : > { %1319 = vst.msk [vmem:[#allocation2] sm:$0xff] %vm619_vm3, %v1315_v52 }
 0x3c6   : > { %v1308_v55 = vpop.permute.xlu1 %1307 }
 0x3c7   : > { %v1317_v56 = vadd.f32 %v1308_v55, %v1289_v53 }
 0x3c9   : > { %1321 = vst.msk [vmem:[#allocation2 + $0x10] sm:$0xff] %vm619_vm3, %v1317_v56 }
 0x3ca   : > { %v1313_v58 = vpop.permute.xlu1 %1312 }
 0x3cb   : > { %v1318_v59 = vadd.f32 %v1313_v58, %v1290_v57  ;;  %v1324_v60 = vld [vmem:[#allocation2 + $0x8] sm:$0xff] }
 0x3cc   : > { %v1323_v61 = vld [vmem:[#allocation2] sm:$0xff] }
 0x3cd   : > { %1322 = vst.msk [vmem:[#allocation2 + $0x18] sm:$0xff] %vm619_vm3, %v1318_v59  ;;  %v1327_v62 = vpack.c.bf16 %v1324_v60, %v1323_v61 }
 0x3cf   : > { %1639 = vmatmul.mubr.msk.bf16.vlgmr.msra.gmra.mrb[8].mxu0 %vm619_vm3, %v1327_v62 }
 0x3d0   : > { %1409 = vmatprep.mubr.bf16.mxu0 %v2290_v41  ;;  %v1325_v63 = vld [vmem:[#allocation2 + $0x10] sm:$0xff] }
 0x3d4   : > { %v1326_v0 = vld [vmem:[#allocation2 + $0x18] sm:$0xff] }
 0x3d5   : > { %v1328_v1 = vpack.c.bf16 %v1326_v0, %v1325_v63 }
 0x3d7   : > { %1640 = vmatmul.mubr.msk.bf16.gmra.mrb[12].mxu0 %vm619_vm3, %v1328_v1 }
 0x4a2   : > { %v1401_v2 = vpop.f32.mrb[8].mxu0 }
 0x4a3   : > { %v1420_v3 = vmul.f32 %v1401_v2, %v2636_v22  ;;  %v1403_v4 = vpop.f32.mrb[9].mxu0 }
 0x4a4   : > { %v1421_v5 = vmul.f32 %v1403_v4, %v2613_v11  ;;  %v1405_v6 = vpop.f32.mrb[10].mxu0 }
 0x4a5   : > { %1428 = vst [vmem:[%s416_s25] sm:$0xff] %v1420_v3  ;;  %v1422_v41 = vmul.f32 %v1405_v6, %v2639_v23  ;;  %v1407_v7 = vpop.f32.mrb[11].mxu0 }
 0x4a6   : > { %1429 = vst [vmem:[%s416_s25 + $0x8] sm:$0xff] %v1421_v5  ;;  %v1423_v8 = vmul.f32 %v1407_v7, %v2616_v12 }
 0x4a7   : > { %1430 = vst [vmem:[%s416_s25 + $0x10] sm:$0xff] %v1422_v41 }
 0x4a8   : > { %1431 = vst [vmem:[%s416_s25 + $0x18] sm:$0xff] %v1423_v8 }
 0x4aa   : > { %v1411_v9 = vpop.f32.mrb[12].mxu0 }
 0x4ab   : > { %v1424_v22 = vmul.f32 %v1411_v9, %v2652_v28  ;;  %v1413_v10 = vpop.f32.mrb[13].mxu0 }
 0x4ac   : > { %v1425_v11 = vmul.f32 %v1413_v10, %v2642_v24  ;;  %v1415_v13 = vpop.f32.mrb[14].mxu0 }
 0x4ad   : > { %1432 = vst [vmem:[%s416_s25 + $0x20] sm:$0xff] %v1424_v22  ;;  %v1426_v12 = vmul.f32 %v1415_v13, %v2655_v29  ;;  %v1417_v23 = vpop.f32.mrb[15].mxu0 }
 0x4ae   : > { %1433 = vst [vmem:[%s416_s25 + $0x28] sm:$0xff] %v1425_v11  ;;  %v1427_v28 = vmul.f32 %v1417_v23, %v2645_v25 }
 0x4af   : > { %1434 = vst [vmem:[%s416_s25 + $0x30] sm:$0xff] %v1426_v12 }
 0x4b0   : > { %1435 = vst [vmem:[%s416_s25 + $0x38] sm:$0xff] %v1427_v28 }
 0x4b1   : > { %2214 = shalt.err (!%p2211_p2)
}
 0x4b2   : > { %s2215_s16 = scalar_lea.hbm %s2741_s13, 1024  ;;  %s2219_s18 = scalar_lea.hbm %s2796_s9, 2048 }
 0x4b3   : > { %p2216_p3 = scmp.ne.s32.totalorder %s2741_s13, %s2215_s16  ;;  %p2220_p7 = scmp.lt.u32.totalorder %s2741_s13, %s2796_s9 }
 0x4b4   : > { %p2221_p8 = scmp.lt.u32.totalorder %s2219_s18, %s2215_s16  ;;  %p2223_p13 = scmp.lt.u32.totalorder %s2215_s16, %s2741_s13 }
 0x4b5   : > { %p2217_p4 = pnand %p2216_p3, %p2828_p1 }
 0x4b6   : > { %p2222_p11 = por %p2221_p8, %p2220_p7 }
 0x4b7   : > { %p2218_p12 = pneg %p2217_p4 }
 0x4b8   : > { %p2224_p6 = por %p2223_p13, %p2222_p11 }
 0x4ba   : > { %p2225_p9 = pnand %p2224_p6, %p2218_p12 }
 0x4bc   : > { %2228 = shalt.err (!%p2225_p9)
}
 0x4bd   : > { %s2293_s20 = smov 256   ;;  %s2294_s22 = smov 16  }
 0x4be   : > { %1894 = dma.vmem_to_hbm [thread:$0]  (%p2828_p1), %s2735_s27, 1024, %s2741_s13, %s2746_s26, %s2293_s20, %s2293_s20, %s2294_s22  }
 0x4bf PF: > { %s2829_s25 = sld [smem:[#allocation20_spill]]  ;;  %s2830_s29 = sld [smem:[#allocation24_spill]] }
 0x4c0   : > { %p1931_p5 = scmp.ge.s32.totalorder %s2279_s12, 2 }
 0x4c5   : > { %s1466_s23 = sand.u32 1, %s2829_s25   ;;  %p2831_p0 = scmp.ne.s32.totalorder %s2830_s29, 0 }
 0x4c6   : > { %s1467_s17 = scalar_lea.sflag [#allocation5], %s1466_s23 }
 0x4c7   : > { %p1916_p10 = pnand %p1931_p5, %p2831_p0 }
 0x4c9   : > { %2262 = dma.done.wait (!%p1916_p10), %s1467_s17, 1024  }
 0x4ca   : > { %2264 = vsyncadd (!%p1916_p10), %s1467_s17, 4294966272  ;;  %s2832_s12 = sld [smem:[#allocation22_spill]]  ;;  %s2833_s15 = sld [smem:[#allocation21_spill]] }
 0x4cb   : > { %s2834_s11 = sld [smem:[#allocation23_spill]]  ;;  %s2835_s30 = smov %s2271_s10 }
 0x4d0   : > { %p23_p2 = scmp.ge.s32.totalorder %s2832_s12, 4   ;;  %s2836_s10 = smov %s2833_s15 }
 0x4d2   :  { %25 = sbr.rel (!%p23_p2) target bundleno = 9 (0x9), region = 116 }
 0x4d9   :  { %1472 = vsyncpa [#allocation4], 1 }
 0x4da   :  { %1474 = vsyncpa [#allocation4 + $0x1], 1 }
 0x4db   :  { %1475 = vsyncpa [#allocation7], 1 }
 0x4dc   :  { %1476 = vsyncpa [#allocation10], 1 }
 0x4dd   :  { %1477 = vsyncpa [#allocation13], 1 }
 0x4de   :  { %1478 = vsyncpa [#allocation5], 1 }
 0x4df   :  { %1480 = vsyncpa [#allocation5 + $0x1], 1 }

</bundles_post_ra>
